<compile_context>
chip_gen: v7x
topology: tpu7x:2x2x1
jax: 0.10.0
libtpu: 0.0.40
codegen_flags: <defaults>
</compile_context>

<pallas_src>
import functools

import jax
import jax.numpy as jnp
from jax.experimental import pallas as pl
from jax.experimental.pallas import tpu as pltpu

_LANE = 128           # pad the classifier head to a lane-dense store width
_MAX_TILE_ROWS = 16384
_SPLIT_ROWS = 4096    # above this many rows, force >=2 tiles (v7x megacore)
_H1, _H2 = 64, 32     # hidden widths from the PyTorch module


def _cdiv(a, b):
    return -(-a // b)


def _round_up(n, m):
    return _cdiv(n, m) * m


def _vmem_capacity_bytes():
    # Trace-time hardware query; conservative fallback (v7x per-TC VMEM).
    try:
        return int(pltpu.get_tpu_info().vmem_capacity_bytes)
    except Exception:
        return 64 << 20


def _mlp_kernel(x_ref, w1_ref, b1_ref, w2_ref, b2_ref, w3_ref, b3_ref, o_ref):
    # Hoist bias reads once at kernel entry (JAX does not CSE broadcasts).
    b1 = b1_ref[...]
    b2 = b2_ref[...]
    b3 = b3_ref[...]

    # bf16 operands, f32 accumulation: single MXU pass per matmul on v5e/v6e/v7x.
    # (No-op cast if the caller already supplies bf16 x.)
    x = x_ref[...].astype(jnp.bfloat16)

    h1 = jnp.dot(x, w1_ref[...], preferred_element_type=jnp.float32) + b1
    h1 = jnp.maximum(h1, 0.0).astype(jnp.bfloat16)

    h2 = jnp.dot(h1, w2_ref[...], preferred_element_type=jnp.float32) + b2
    h2 = jnp.maximum(h2, 0.0).astype(jnp.bfloat16)

    out = jnp.dot(h2, w3_ref[...], preferred_element_type=jnp.float32) + b3
    # Last dim is a multiple of 128 -> unmasked lane-dense stores; bf16 store
    # halves the dominant HBM writeback stream.
    o_ref[...] = out.astype(o_ref.dtype)


@jax.jit
def node_classifier_forward(x, params):
    """x: (N, input_dim) f32 or bf16; params: dict of w1,b1,w2,b2,w3,b3 (f32)."""
    n, d = x.shape
    classes = params["w3"].shape[1]
    c_pad = _round_up(classes, _LANE)

    x_itemsize = jnp.dtype(x.dtype).itemsize
    out_itemsize = 2  # bf16 output store

    # ---- D/classes/VMEM-aware row-tile sizing -------------------------------
    # Resident weight bytes (bf16 weights, f32 biases; x2 for buffering slack).
    weight_bytes = 2 * ((d * _H1 + _H1 * _H2 + _H2 * c_pad) * 2
                        + (_H1 + _H2 + c_pad) * 4)
    # Per-row VMEM: double-buffered x and out blocks + internal intermediates
    # (x bf16 copy, h1/h2 in f32+bf16, f32 out before cast), with 1.5x slack.
    internal_per_row = int(1.5 * (2 * d + 6 * _H1 + 6 * _H2 + 4 * c_pad))
    per_row = 2 * (d * x_itemsize + c_pad * out_itemsize) + internal_per_row

    capacity = _vmem_capacity_bytes()
    budget = min(capacity // 2, 32 << 20)
    tn_cap = (budget - weight_bytes - (2 << 20)) // per_row
    tn_cap = min(_MAX_TILE_ROWS, max(8, (tn_cap // 8) * 8))

    # ---- Balanced tiles; >=2 (even) tiles for medium/large N (v7x megacore) --
    n8 = _round_up(n, 8)
    num_tiles = _cdiv(n8, tn_cap)
    if num_tiles == 1 and n8 >= _SPLIT_ROWS:
        num_tiles = 2
    if num_tiles > 1:
        num_tiles += num_tiles & 1  # even tile count keeps both TCs busy
    tn = _round_up(_cdiv(n8, num_tiles), 8)
    n_pad = num_tiles * tn

    x_p = x if n_pad == n else jnp.pad(x, ((0, n_pad - n), (0, 0)))

    # bf16 weights (tiny, resident in VMEM); biases stay f32; pad head to 128 lanes.
    w1 = params["w1"].astype(jnp.bfloat16)
    w2 = params["w2"].astype(jnp.bfloat16)
    w3 = jnp.pad(params["w3"], ((0, 0), (0, c_pad - classes))).astype(jnp.bfloat16)
    b1 = params["b1"].astype(jnp.float32)
    b2 = params["b2"].astype(jnp.float32)
    b3 = jnp.pad(params["b3"], ((0, 0), (0, c_pad - classes))).astype(jnp.float32)

    vmem = pltpu.MemorySpace.VMEM

    def row_spec(width):
        return pl.BlockSpec((tn, width), lambda i: (i, 0), memory_space=vmem)

    def resident(a):
        # Constant index_map: DMA'd once, resident across the whole grid.
        return pl.BlockSpec(a.shape, lambda i: (0, 0), memory_space=vmem)

    flops = 2 * n_pad * (d * _H1 + _H1 * _H2 + _H2 * c_pad)
    bytes_accessed = (
        n_pad * d * x_itemsize                 # x read
        + n_pad * c_pad * out_itemsize         # bf16 output write
        + sum(a.size * a.dtype.itemsize for a in (w1, b1, w2, b2, w3, b3))
    )

    working_set = weight_bytes + per_row * tn
    vmem_limit = int(min(max(working_set + (8 << 20), 32 << 20), capacity))

    out = pl.pallas_call(
        _mlp_kernel,
        out_shape=jax.ShapeDtypeStruct((n_pad, c_pad), jnp.bfloat16),
        grid=(num_tiles,),
        in_specs=[
            row_spec(d),
            resident(w1), resident(b1),
            resident(w2), resident(b2),
            resident(w3), resident(b3),
        ],
        out_specs=pl.BlockSpec((tn, c_pad), lambda i: (i, 0), memory_space=vmem),
        compiler_params=pltpu.CompilerParams(
            dimension_semantics=("parallel",),   # row tiles shard across v7x's 2 TCs
            vmem_limit_bytes=vmem_limit),
        cost_estimate=pl.CostEstimate(
            flops=flops, transcendentals=0, bytes_accessed=bytes_accessed),
    )(x_p, w1, b1, w2, b2, w3, b3)

    # Slice off row/class padding, return f32 logits (PyTorch module semantics).
    # TODO(synk): if downstream can consume bf16 logits, drop this cast.
    return out[:n, :classes].astype(jnp.float32)


def init_params(key, input_dim, classes):
    """Deterministic init mirroring PyTorch Linear default: U(-1/sqrt(fan_in), 1/sqrt(fan_in))."""
    dims = [(input_dim, _H1), (_H1, _H2), (_H2, classes)]
    params = {}
    for i, (fan_in, fan_out) in enumerate(dims, start=1):
        key, kw, kb = jax.random.split(key, 3)
        bound = 1.0 / jnp.sqrt(jnp.float32(fan_in))
        params[f"w{i}"] = jax.random.uniform(
            kw, (fan_in, fan_out), jnp.float32, -bound, bound)
        params[f"b{i}"] = jax.random.uniform(
            kb, (1, fan_out), jnp.float32, -bound, bound)
    return params


def reference_forward(x, p):
    h1 = jnp.maximum(x @ p["w1"] + p["b1"], 0.0)
    h2 = jnp.maximum(h1 @ p["w2"] + p["b2"], 0.0)
    return h2 @ p["w3"] + p["b3"]


if __name__ == "__main__":
    key = jax.random.PRNGKey(0)
    N, INPUT_DIM, CLASSES = 8, 32, 10

    key, kx = jax.random.split(key)
    x = jax.random.normal(kx, (N, INPUT_DIM), jnp.float32)
    params = init_params(key, INPUT_DIM, CLASSES)

    out = node_classifier_forward(x, params)
    out = jax.block_until_ready(out)

    ref = reference_forward(x, params)
    assert out.shape == (N, CLASSES)
    # bf16 matmul operands + bf16 output store vs the pure-f32 reference:
    # tolerance sized to bf16's ~2^-8 relative precision over three small layers.
    assert jnp.allclose(out, ref, atol=5e-2, rtol=5e-2), "mismatch vs JAX reference"

    print("KERNEL_OK")
</pallas_src>

<mosaic_0001>
module attributes {stable_mosaic.version = 11 : i64} {
  func.func @_mlp_kernel(%arg0: i32, %arg1: memref<8x32xf32, #tpu.memory_space<vmem>>, %arg2: memref<32x64xbf16, #tpu.memory_space<vmem>>, %arg3: memref<1x64xf32, #tpu.memory_space<vmem>>, %arg4: memref<64x32xbf16, #tpu.memory_space<vmem>>, %arg5: memref<1x32xf32, #tpu.memory_space<vmem>>, %arg6: memref<32x128xbf16, #tpu.memory_space<vmem>>, %arg7: memref<1x128xf32, #tpu.memory_space<vmem>>, %arg8: memref<8x128xbf16, #tpu.memory_space<vmem>>) attributes {dimension_semantics = [#tpu.dimension_semantics<parallel>], iteration_bounds = array<i64: 1>, scalar_prefetch = 0 : i64, scratch_operands = 0 : i64, tpu.core_type = #tpu.core_type<tc>, window_params = [{transform_indices = @transform_0, window_bounds = array<i64: 8, 32>}, {pipeline_mode = #tpu.pipeline_mode<synchronous>, transform_indices = @transform_1, window_bounds = array<i64: 32, 64>}, {pipeline_mode = #tpu.pipeline_mode<synchronous>, transform_indices = @transform_2, window_bounds = array<i64: 1, 64>}, {pipeline_mode = #tpu.pipeline_mode<synchronous>, transform_indices = @transform_3, window_bounds = array<i64: 64, 32>}, {pipeline_mode = #tpu.pipeline_mode<synchronous>, transform_indices = @transform_4, window_bounds = array<i64: 1, 32>}, {pipeline_mode = #tpu.pipeline_mode<synchronous>, transform_indices = @transform_5, window_bounds = array<i64: 32, 128>}, {pipeline_mode = #tpu.pipeline_mode<synchronous>, transform_indices = @transform_6, window_bounds = array<i64: 1, 128>}, {transform_indices = @transform_7, window_bounds = array<i64: 8, 128>}]} {
    %c0 = arith.constant 0 : index
    %c0_0 = arith.constant 0 : index
    %0 = vector.load %arg3[%c0, %c0_0] : memref<1x64xf32, #tpu.memory_space<vmem>>, vector<1x64xf32>
    %c0_1 = arith.constant 0 : index
    %c0_2 = arith.constant 0 : index
    %1 = vector.load %arg5[%c0_1, %c0_2] : memref<1x32xf32, #tpu.memory_space<vmem>>, vector<1x32xf32>
    %c0_3 = arith.constant 0 : index
    %c0_4 = arith.constant 0 : index
    %2 = vector.load %arg7[%c0_3, %c0_4] : memref<1x128xf32, #tpu.memory_space<vmem>>, vector<1x128xf32>
    %c0_5 = arith.constant 0 : index
    %c0_6 = arith.constant 0 : index
    %3 = vector.load %arg1[%c0_5, %c0_6] : memref<8x32xf32, #tpu.memory_space<vmem>>, vector<8x32xf32>
    %4 = arith.truncf %3 : vector<8x32xf32> to vector<8x32xbf16>
    %c0_7 = arith.constant 0 : index
    %c0_8 = arith.constant 0 : index
    %5 = vector.load %arg2[%c0_7, %c0_8] : memref<32x64xbf16, #tpu.memory_space<vmem>>, vector<32x64xbf16>
    %cst = arith.constant dense<0.000000e+00> : vector<8x64xf32>
    %6 = tpu.matmul %4, %5, %cst {dimension_numbers = #tpu.dot_dimension_numbers<[1], [0], [0], [1], [0, 0, 1, 1], [], []>} : vector<8x32xbf16>, vector<32x64xbf16>, vector<8x64xf32> -> vector<8x64xf32>
    %7 = vector.broadcast %0 : vector<1x64xf32> to vector<8x64xf32>
    %8 = arith.addf %6, %7 : vector<8x64xf32>
    %cst_9 = arith.constant 0.000000e+00 : f32
    %9 = vector.broadcast %cst_9 : f32 to vector<8x64xf32>
    %10 = arith.maximumf %8, %9 : vector<8x64xf32>
    %11 = arith.truncf %10 : vector<8x64xf32> to vector<8x64xbf16>
    %c0_10 = arith.constant 0 : index
    %c0_11 = arith.constant 0 : index
    %12 = vector.load %arg4[%c0_10, %c0_11] : memref<64x32xbf16, #tpu.memory_space<vmem>>, vector<64x32xbf16>
    %cst_12 = arith.constant dense<0.000000e+00> : vector<8x32xf32>
    %13 = tpu.matmul %11, %12, %cst_12 {dimension_numbers = #tpu.dot_dimension_numbers<[1], [0], [0], [1], [0, 0, 1, 1], [], []>} : vector<8x64xbf16>, vector<64x32xbf16>, vector<8x32xf32> -> vector<8x32xf32>
    %14 = vector.broadcast %1 : vector<1x32xf32> to vector<8x32xf32>
    %15 = arith.addf %13, %14 : vector<8x32xf32>
    %cst_13 = arith.constant 0.000000e+00 : f32
    %16 = vector.broadcast %cst_13 : f32 to vector<8x32xf32>
    %17 = arith.maximumf %15, %16 : vector<8x32xf32>
    %18 = arith.truncf %17 : vector<8x32xf32> to vector<8x32xbf16>
    %c0_14 = arith.constant 0 : index
    %c0_15 = arith.constant 0 : index
    %19 = vector.load %arg6[%c0_14, %c0_15] : memref<32x128xbf16, #tpu.memory_space<vmem>>, vector<32x128xbf16>
    %cst_16 = arith.constant dense<0.000000e+00> : vector<8x128xf32>
    %20 = tpu.matmul %18, %19, %cst_16 {dimension_numbers = #tpu.dot_dimension_numbers<[1], [0], [0], [1], [0, 0, 1, 1], [], []>} : vector<8x32xbf16>, vector<32x128xbf16>, vector<8x128xf32> -> vector<8x128xf32>
    %21 = vector.broadcast %2 : vector<1x128xf32> to vector<8x128xf32>
    %22 = arith.addf %20, %21 : vector<8x128xf32>
    %23 = arith.truncf %22 : vector<8x128xf32> to vector<8x128xbf16>
    %c0_17 = arith.constant 0 : index
    %c0_18 = arith.constant 0 : index
    %24 = vector.load %arg8[%c0_17, %c0_18] : memref<8x128xbf16, #tpu.memory_space<vmem>>, vector<8x128xbf16>
    tpu.vector_store %arg8[%c0_17, %c0_18], %23 {strides = array<i32>} : memref<8x128xbf16, #tpu.memory_space<vmem>>, vector<8x128xbf16>,
    return
  }
  func.func @transform_0(%arg0: i32) -> (i32, i32) {
    %c0_i32 = arith.constant 0 : i32
    %c0_i32_0 = arith.constant 0 : i32
    return %arg0, %c0_i32 : i32, i32
  }
  func.func @transform_1(%arg0: i32) -> (i32, i32) {
    %c0_i32 = arith.constant 0 : i32
    %c0_i32_0 = arith.constant 0 : i32
    %c0_i32_1 = arith.constant 0 : i32
    return %c0_i32, %c0_i32_0 : i32, i32
  }
  func.func @transform_2(%arg0: i32) -> (i32, i32) {
    %c0_i32 = arith.constant 0 : i32
    %c0_i32_0 = arith.constant 0 : i32
    %c0_i32_1 = arith.constant 0 : i32
    return %c0_i32, %c0_i32_0 : i32, i32
  }
  func.func @transform_3(%arg0: i32) -> (i32, i32) {
    %c0_i32 = arith.constant 0 : i32
    %c0_i32_0 = arith.constant 0 : i32
    %c0_i32_1 = arith.constant 0 : i32
    return %c0_i32, %c0_i32_0 : i32, i32
  }
  func.func @transform_4(%arg0: i32) -> (i32, i32) {
    %c0_i32 = arith.constant 0 : i32
    %c0_i32_0 = arith.constant 0 : i32
    %c0_i32_1 = arith.constant 0 : i32
    return %c0_i32, %c0_i32_0 : i32, i32
  }
  func.func @transform_5(%arg0: i32) -> (i32, i32) {
    %c0_i32 = arith.constant 0 : i32
    %c0_i32_0 = arith.constant 0 : i32
    %c0_i32_1 = arith.constant 0 : i32
    return %c0_i32, %c0_i32_0 : i32, i32
  }
  func.func @transform_6(%arg0: i32) -> (i32, i32) {
    %c0_i32 = arith.constant 0 : i32
    %c0_i32_0 = arith.constant 0 : i32
    %c0_i32_1 = arith.constant 0 : i32
    return %c0_i32, %c0_i32_0 : i32, i32
  }
  func.func @transform_7(%arg0: i32) -> (i32, i32) {
    %c0_i32 = arith.constant 0 : i32
    %c0_i32_0 = arith.constant 0 : i32
    return %arg0, %c0_i32 : i32, i32
  }
}

</mosaic_0001>

<bundles_post_ra>
// kernel: node_classifier_forward.1
= control target key start
LH: loop header
LB: loop body
LE: loop exit
PB: predicated region body
PF: predicated region fallthrough
CT: control target
= control target key end

     0   :  { %v318_v0 = vmov 0.0   ;;  %vm319_vm0 = vmmov 0   ;;  %vm54_vm1 = vcmask 261120   ;;  %vm138_vm2 = vcmask 523264   ;;  %s404_s1 = inlined_call_operand.vmem [shape: bf16[32,64], index: 1, kind: input, shape index: {}]   ;;  %s405_s0 = inlined_call_operand.vmem [shape: f32[8,32], index: 0, kind: input, shape index: {}]   ;;  %s406_s3 = inlined_call_operand.vmem [shape: bf16[64,32], index: 3, kind: input, shape index: {}]   ;;  %s407_s5 = inlined_call_operand.vmem [shape: bf16[32,128], index: 5, kind: input, shape index: {}]   ;;  %s408_s2 = inlined_call_operand.vmem [shape: f32[1,64], index: 2, kind: input, shape index: {}]   ;;  %s409_s4 = inlined_call_operand.vmem [shape: f32[1,32], index: 4, kind: input, shape index: {}]   ;;  %s410_s6 = inlined_call_operand.vmem [shape: f32[1,128], index: 6, kind: input, shape index: {}]   ;;  %s411_s7 = inlined_call_operand.vmem [shape: bf16[8,128], index: 7, kind: output, shape index: {}]  }
   0x1   :  { %280 = vmatprep.subr.bf16.mxu0 %v318_v0  ;;  %v310_v1 = vld [vmem:[%s404_s1] sm:$0xff]   ;;  %284 = vmatprep.mubr.msk.bf16.mxu0 %vm319_vm0, %v318_v0  ;;  %v311_v2 = vld [vmem:[%s404_s1 + $0x8] sm:$0xff]   ;;  %v314_v7 = vld [vmem:[%s406_s3 + $0x10] sm:$0xff]  }
   0x2   :  { %288 = vmatprep.subr.bf16.mxu1 %v318_v0  ;;  %296 = vmatprep.mubr.msk.bf16.mxu1 %vm319_vm0, %v318_v0  ;;  %v30_v3 = vld [vmem:[%s405_s0] sm:$0xff]  ;;  %v313_v5 = vld [vmem:[%s406_s3 + $0x8] sm:$0xff]   ;;  %v315_v8 = vld [vmem:[%s406_s3 + $0x18] sm:$0xff]  }
   0x3   :  { %281 = vmatpush3.bf16.msra.mxu0 %v310_v1  ;;  %v312_v4 = vld [vmem:[%s406_s3] sm:$0xff]   ;;  %v31_v6 = vpack.c.bf16 %v30_v3, %v30_v3  ;;  %v317_v18 = vld [vmem:[%s407_s5 + $0x8] sm:$0xff]  }
   0x4   :  { %282 = vmatprep.subr.bf16.mxu0 %v318_v0  ;;  %289 = vmatpush3.bf16.msra.mxu1 %v312_v4  ;;  %v316_v9 = vld [vmem:[%s407_s5] sm:$0xff]  }
   0x5   :  { %290 = vmatprep.subr.bf16.mxu1 %v318_v0  ;;  %v255_v10 = vld [vmem:[%s408_s2] ss:$0 sm:$0xff] }
   0x6   :  { %v259_v19 = vld [vmem:[%s409_s4] ss:$0 sm:$0xff] }
   0x7   :  { %283 = vmatpush3.bf16.msra.mxu0 %v311_v2  ;;  %v265_v27 = vld [vmem:[%s410_s6] ss:$0 sm:$0xff] }
   0x8   :  { %300 = vmatprep.subr.bf16.mxu0 %v318_v0  ;;  %291 = vmatpush3.bf16.msra.mxu1 %v313_v5 }
   0x9   :  { %292 = vmatprep.subr.bf16.mxu1 %v318_v0 }
   0xa   :  { %285 = vmatmul.mubr.msk.bf16.vlgmr.msra.gmra.mrb[0].mxu0 %vm54_vm1, %v31_v6 }
   0xb   :  { %304 = vmatprep.mubr.msk.bf16.mxu0 %vm319_vm0, %v318_v0  ;;  %301 = vmatpush3.bf16.msra.mxu0 %v316_v9 }
   0xc   :  { %293 = vmatpush3.bf16.msra.mxu1 %v314_v7  ;;  %302 = vmatprep.subr.bf16.mxu0 %v318_v0 }
   0xd   :  { %294 = vmatprep.subr.bf16.mxu1 %v318_v0 }
   0xf   :  { %303 = vmatpush3.bf16.msra.mxu0 %v317_v18 }
  0x10   :  { %295 = vmatpush3.bf16.msra.mxu1 %v315_v8 }
  0xdd   :  { %v92_v11 = vpop.f32.mrb[0].mxu0 }
  0xde   :  { %v93_v12 = vadd.f32 %v255_v10, %v92_v11  ;;  %v286_v13 = vpop.f32.mrb[1].mxu0 }
  0xdf   :  { %v95_v14 = vpop.f32.mrb[2].mxu0 }
  0xe0   :  { %v98_v15 = vmax.f32 %v93_v12, 0.0  ;;  %v287_v16 = vpop.f32.mrb[3].mxu0 }
  0xe2   :  { %v99_v17 = vpack.c.bf16 %v98_v15, %v98_v15 }
  0xe4   :  { %297 = vmatmul.mubr.msk.bf16.vlgmr.msra.gmra.mrb[0].mxu1 %vm138_vm2, %v99_v17 }
 0x1b7   :  { %v176_v20 = vpop.f32.mrb[0].mxu1 }
 0x1b8   :  { %v177_v21 = vadd.f32 %v259_v19, %v176_v20  ;;  %v298_v22 = vpop.f32.mrb[1].mxu1 }
 0x1b9   :  { %v179_v23 = vpop.f32.mrb[2].mxu1 }
 0x1ba   :  { %v182_v24 = vmax.f32 %v177_v21, 0.0  ;;  %v299_v25 = vpop.f32.mrb[3].mxu1 }
 0x1bc   :  { %v183_v26 = vpack.c.bf16 %v182_v24, %v182_v24 }
 0x1be   :  { %305 = vmatmul.mubr.msk.bf16.vlgmr.msra.gmra.mrb[4].mxu0 %vm54_vm1, %v183_v26 }
 0x291   :  { %v243_v28 = vpop.f32.mrb[4].mxu0 }
 0x292   :  { %v244_v29 = vadd.f32 %v265_v27, %v243_v28  ;;  %v306_v30 = vpop.f32.mrb[5].mxu0 }
 0x293   :  { %v246_v31 = vpop.f32.mrb[6].mxu0 }
 0x294   :  { %v249_v32 = vpack.c.bf16 %v244_v29, %v244_v29  ;;  %v307_v33 = vpop.f32.mrb[7].mxu0 }
 0x296   :  { %250 = vst [vmem:[%s411_s7] sm:$0xf] %v249_v32 }

</bundles_post_ra>
